<compile_context>
chip_gen: v7x
topology: tpu7x:2x2x1
jax: 0.10.0
libtpu: 0.0.40
codegen_flags: <defaults>
</compile_context>

<pallas_src>
import functools

import jax
import jax.numpy as jnp
from jax import lax
from jax.experimental import pallas as pl
from jax.experimental.pallas import tpu as pltpu


def _round_up(x, m):
    return ((x + m - 1) // m) * m


def _pick_divisor(n, candidates):
    """Largest candidate that divides n exactly, else n itself."""
    for c in candidates:
        if n % c == 0:
            return c
    return n


# ----------------------------------------------------------------------------
# Kernel 1: tiled matmul (+ optional bias)   out = x @ w (+ b)
#   grid = (cdiv(M,tm), cdiv(N,tn), K/tk), f32 accumulator scratch,
#   init/finalize with pl.when on the (arbitrary) K axis.
# ----------------------------------------------------------------------------
def _matmul_kernel(x_ref, w_ref, o_ref, acc_ref):
    @pl.when(pl.program_id(2) == 0)
    def _():
        acc_ref[...] = jnp.zeros_like(acc_ref)

    acc_ref[...] += jnp.dot(
        x_ref[...], w_ref[...], preferred_element_type=jnp.float32
    )

    @pl.when(pl.program_id(2) == pl.num_programs(2) - 1)
    def _():
        o_ref[...] = acc_ref[...].astype(o_ref.dtype)


def _matmul_bias_kernel(x_ref, w_ref, b_ref, o_ref, acc_ref):
    @pl.when(pl.program_id(2) == 0)
    def _():
        acc_ref[...] = jnp.zeros_like(acc_ref)

    acc_ref[...] += jnp.dot(
        x_ref[...], w_ref[...], preferred_element_type=jnp.float32
    )

    @pl.when(pl.program_id(2) == pl.num_programs(2) - 1)
    def _():
        o_ref[...] = (acc_ref[...] + b_ref[...].astype(jnp.float32)).astype(
            o_ref.dtype
        )


def pallas_matmul(x, w, bias=None, *, tm=256, tn=256, out_dtype=None):
    """x: [M, K], w: [K, N], bias: [N] or None -> [M, N].

    - M / N are never padded: edge tiles are partial blocks (garbage padding
      only ever lands in output rows/cols that are masked on store).
    - K <= 1024 runs in a single full-K step (no reduction revisits and no
      K padding); larger K is padded to a 128 multiple and tiled with a tk
      that divides it exactly (no wasted MXU work).
    """
    M, K = x.shape
    K2, N = w.shape
    assert K == K2
    out_dtype = out_dtype or x.dtype

    # K handling (contraction dim must be exactly covered with real data).
    if K <= 1024:
        Kp, tk = K, K
    else:
        Kp = _round_up(K, 128)
        if Kp != K:
            x = jnp.pad(x, ((0, 0), (0, Kp - K)))
            w = jnp.pad(w, ((0, Kp - K), (0, 0)))
        tk = _pick_divisor(Kp, (512, 256, 128))

    tm = M if M <= tm else tm            # full-dim block is always legal
    tn = N if N <= tn else tn            # tn default is a multiple of 128

    grid = (pl.cdiv(M, tm), pl.cdiv(N, tn), Kp // tk)
    itemsize = jnp.dtype(x.dtype).itemsize
    cost = pl.CostEstimate(
        flops=2 * M * N * Kp,
        transcendentals=0,
        bytes_accessed=(M * Kp + Kp * N + M * N) * itemsize,
    )

    x_spec = pl.BlockSpec((tm, tk), lambda i, j, k: (i, k))
    w_spec = pl.BlockSpec((tk, tn), lambda i, j, k: (k, j))
    o_spec = pl.BlockSpec((tm, tn), lambda i, j, k: (i, j))
    params = pltpu.CompilerParams(
        dimension_semantics=("parallel", "parallel", "arbitrary")
    )

    if bias is None:
        return pl.pallas_call(
            _matmul_kernel,
            out_shape=jax.ShapeDtypeStruct((M, N), out_dtype),
            grid=grid,
            in_specs=[x_spec, w_spec],
            out_specs=o_spec,
            scratch_shapes=[pltpu.VMEM((tm, tn), jnp.float32)],
            compiler_params=params,
            cost_estimate=cost,
        )(x, w)

    b2 = bias.reshape(1, N)
    b_spec = pl.BlockSpec((1, tn), lambda i, j, k: (0, j))
    return pl.pallas_call(
        _matmul_bias_kernel,
        out_shape=jax.ShapeDtypeStruct((M, N), out_dtype),
        grid=grid,
        in_specs=[x_spec, w_spec, b_spec],
        out_specs=o_spec,
        scratch_shapes=[pltpu.VMEM((tm, tn), jnp.float32)],
        compiler_params=params,
        cost_estimate=cost,
    )(x, w, b2)


# ----------------------------------------------------------------------------
# Kernel 2: flash-style multi-head attention.
#   grid = (B, Nq/tq, Nkv/tkv); kv axis last, "arbitrary".
#   q tile : [1, tq,  inner]    k/v tiles : [1, tkv, inner]
#   scratch: running max m (H,tq,1), denom l (H,tq,1), acc (H,tq,D)  (all f32)
#   out    : [1, tq, inner]     (one lane-dense store per q tile)
# Heads are a small static Python loop (unrolled at trace time).
# ----------------------------------------------------------------------------
def _flash_attn_kernel(q_ref, k_ref, v_ref, o_ref, m_ref, l_ref, acc_ref,
                       *, heads, dim_head, scale):
    kv_idx = pl.program_id(2)

    @pl.when(kv_idx == 0)
    def _():
        m_ref[...] = jnp.full_like(m_ref, -jnp.inf)
        l_ref[...] = jnp.zeros_like(l_ref)
        acc_ref[...] = jnp.zeros_like(acc_ref)

    q_all = q_ref[0]                       # (tq,  inner), input dtype
    k_all = k_ref[0]                       # (tkv, inner)
    v_all = v_ref[0]                       # (tkv, inner)

    for hi in range(heads):
        lo = hi * dim_head
        # Fold the softmax scale into Q (tq*D mults, not tq*tkv), keep the
        # MXU operands in the input dtype (bf16-rate matmul for bf16 inputs).
        q = q_all[:, lo:lo + dim_head] * jnp.asarray(scale, q_all.dtype)
        k = k_all[:, lo:lo + dim_head]
        v = v_all[:, lo:lo + dim_head]

        # scores = q @ k^T without materializing a transpose.
        s = lax.dot_general(
            q, k,
            dimension_numbers=(((1,), (1,)), ((), ())),
            preferred_element_type=jnp.float32,
        )                                   # (tq, tkv) f32

        m_prev = m_ref[hi]                  # (tq, 1)
        m_new = jnp.maximum(m_prev, jnp.max(s, axis=-1, keepdims=True))
        alpha = jnp.exp(m_prev - m_new)     # rescale of previous partials
        p = jnp.exp(s - m_new)              # un-normalized probabilities

        l_ref[hi] = alpha * l_ref[hi] + jnp.sum(p, axis=-1, keepdims=True)
        # Deferred normalization: PV on un-normalized p, divide once at the end.
        acc_ref[hi] = alpha * acc_ref[hi] + jnp.dot(
            p.astype(v.dtype), v, preferred_element_type=jnp.float32
        )
        m_ref[hi] = m_new

    @pl.when(kv_idx == pl.num_programs(2) - 1)
    def _():
        outs = []
        for hi in range(heads):
            outs.append(acc_ref[hi] / l_ref[hi])   # exact divide, finalize only
        # Single lane-dense store of all heads.
        o_ref[0] = jnp.concatenate(outs, axis=-1).astype(o_ref.dtype)


def _seq_tile(n, candidates):
    for c in candidates:
        if n % c == 0:
            return min(c, n)
    return n


def pallas_attention(qkv, heads, dim_head, scale, out_dtype=None):
    """qkv: [B, N, 3*H*D] -> out: [B, N, H*D] (heads concatenated)."""
    b, n, three_inner = qkv.shape
    inner = heads * dim_head
    assert three_inner == 3 * inner
    out_dtype = out_dtype or qkv.dtype
    itemsize = jnp.dtype(qkv.dtype).itemsize

    tq = _seq_tile(n, (256, 128))
    tkv = _seq_tile(n, (512, 256, 128))
    grid = (b, n // tq, n // tkv)

    if inner % 128 == 0:
        # No wrapper-side split: pass the packed buffer three times; the
        # last-dim block index (0/1/2) selects the Q / K / V third.
        args = (qkv, qkv, qkv)
        q_spec = pl.BlockSpec((1, tq, inner), lambda bi, qi, ki: (bi, qi, 0))
        k_spec = pl.BlockSpec((1, tkv, inner), lambda bi, qi, ki: (bi, ki, 1))
        v_spec = pl.BlockSpec((1, tkv, inner), lambda bi, qi, ki: (bi, ki, 2))
    else:
        # inner < 128 (tiny shapes): a last-dim block of `inner` would violate
        # the 128-lane block constraint, so split in the wrapper instead.
        q, k, v = jnp.split(qkv, 3, axis=-1)
        args = (q, k, v)
        q_spec = pl.BlockSpec((1, tq, inner), lambda bi, qi, ki: (bi, qi, 0))
        k_spec = pl.BlockSpec((1, tkv, inner), lambda bi, qi, ki: (bi, ki, 0))
        v_spec = pl.BlockSpec((1, tkv, inner), lambda bi, qi, ki: (bi, ki, 0))

    # VMEM budget: double-buffered q/k/v/out tiles + scratch + score temps.
    est = (2 * (tq + 2 * tkv + tq) * inner * itemsize
           + heads * tq * (dim_head + 2) * 4
           + 3 * tq * tkv * 4)
    vmem_limit = int(min(max(4 * est, 32 * 1024 * 1024), 64 * 1024 * 1024))

    cost = pl.CostEstimate(
        flops=4 * b * heads * n * n * dim_head,
        transcendentals=b * heads * n * n,
        bytes_accessed=(3 * b * n * inner + b * n * inner) * itemsize,
    )

    return pl.pallas_call(
        functools.partial(
            _flash_attn_kernel, heads=heads, dim_head=dim_head, scale=scale
        ),
        out_shape=jax.ShapeDtypeStruct((b, n, inner), out_dtype),
        grid=grid,
        in_specs=[q_spec, k_spec, v_spec],
        out_specs=pl.BlockSpec((1, tq, inner), lambda bi, qi, ki: (bi, qi, 0)),
        scratch_shapes=[
            pltpu.VMEM((heads, tq, 1), jnp.float32),         # running max
            pltpu.VMEM((heads, tq, 1), jnp.float32),         # running denom
            pltpu.VMEM((heads, tq, dim_head), jnp.float32),  # accumulator
        ],
        compiler_params=pltpu.CompilerParams(
            dimension_semantics=("parallel", "parallel", "arbitrary"),
            vmem_limit_bytes=vmem_limit,
        ),
        cost_estimate=cost,
    )(*args)


# ----------------------------------------------------------------------------
# Module: parameters + forward (glue in plain JAX, matmuls/attention in Pallas)
# ----------------------------------------------------------------------------
class AttentionPallas:
    def __init__(self, dim, heads=8, dim_head=64, dropout=0.0, key=None):
        inner_dim = dim_head * heads
        self.heads = heads
        self.dim_head = dim_head
        self.scale = dim_head ** (-0.5)
        self.project_out = not (heads == 1 and dim_head == dim)
        # TODO(synk): dropout is treated as identity (inference, p has no
        # effect in eval mode); no RNG dropout kernel implemented.

        if key is None:
            key = jax.random.PRNGKey(0)
        k1, k2, k3 = jax.random.split(key, 3)
        # Stored already transposed relative to torch's nn.Linear:
        #   w_qkv: [dim, 3*inner_dim]   so that  x @ w_qkv == x @ W_qkv^T
        #   w_out: [inner_dim, dim], b_out: [dim]  (nn.Linear default bias=True)
        self.w_qkv = (jax.random.normal(k1, (dim, inner_dim * 3), jnp.float32)
                      * (dim ** -0.5))
        if self.project_out:
            self.w_out = (jax.random.normal(k2, (inner_dim, dim), jnp.float32)
                          * (inner_dim ** -0.5))
            self.b_out = jax.random.normal(k3, (dim,), jnp.float32) * 0.02
        else:
            self.w_out = None
            self.b_out = None

    def __call__(self, x):
        b, n, dim = x.shape
        h, d = self.heads, self.dim_head
        inner = h * d

        # to_qkv : Linear(dim -> 3*inner_dim, bias=False), tiled + pipelined.
        qkv = pallas_matmul(x.reshape(b * n, dim), self.w_qkv)   # (b*n, 3*inner)
        qkv = qkv.reshape(b, n, 3 * inner)

        # Flash-style multi-head attention; heads are split inside the kernel
        # and the output comes back already in (b, n, h*d) layout.
        out = pallas_attention(qkv, h, d, self.scale)            # (b, n, inner)

        # to_out : Linear(inner_dim -> dim) (+ Dropout(0.0) = identity)
        if self.project_out:
            out = pallas_matmul(out.reshape(b * n, inner), self.w_out,
                                bias=self.b_out)
            out = out.reshape(b, n, dim)
        return out


# ----------------------------------------------------------------------------
# Reference (pure JAX) for a sanity check.
# ----------------------------------------------------------------------------
def reference_forward(mod, x):
    b, n, dim = x.shape
    h, d = mod.heads, mod.dim_head
    qkv = x @ mod.w_qkv
    q, k, v = jnp.split(qkv, 3, axis=-1)
    sh = lambda t: jnp.transpose(t.reshape(b, n, h, d), (0, 2, 1, 3))
    q, k, v = map(sh, (q, k, v))
    dots = jnp.einsum("bhid,bhjd->bhij", q, k) * mod.scale
    attn = jax.nn.softmax(dots, axis=-1)
    out = jnp.einsum("bhij,bhjd->bhid", attn, v)
    out = jnp.transpose(out, (0, 2, 1, 3)).reshape(b, n, h * d)
    if mod.project_out:
        out = out @ mod.w_out + mod.b_out
    return out


if __name__ == "__main__":
    # Small shapes consistent with the module's forward: x is [b, n, dim].
    B, N, DIM = 2, 8, 32
    HEADS, DIM_HEAD = 4, 16

    key = jax.random.PRNGKey(0)
    kx, kp = jax.random.split(key)
    x = jax.random.normal(kx, (B, N, DIM), jnp.float32)

    mod = AttentionPallas(DIM, heads=HEADS, dim_head=DIM_HEAD, dropout=0.0, key=kp)

    out = jax.block_until_ready(mod(x))
    ref = reference_forward(mod, x)

    assert out.shape == (B, N, DIM)
    assert jnp.allclose(out, ref, atol=1e-3, rtol=1e-3), float(
        jnp.max(jnp.abs(out - ref))
    )

    print("KERNEL_OK")
</pallas_src>

<mosaic_0001>
module attributes {stable_mosaic.version = 11 : i64} {
  func.func @_matmul_kernel(%arg0: i32, %arg1: i32, %arg2: i32, %arg3: memref<16x32xf32, #tpu.memory_space<vmem>>, %arg4: memref<32x192xf32, #tpu.memory_space<vmem>>, %arg5: memref<16x192xf32, #tpu.memory_space<vmem>>, %arg6: memref<16x192xf32, #tpu.memory_space<vmem>>) attributes {dimension_semantics = [#tpu.dimension_semantics<parallel>, #tpu.dimension_semantics<parallel>, #tpu.dimension_semantics<arbitrary>], iteration_bounds = array<i64: 1, 1, 1>, scalar_prefetch = 0 : i64, scratch_operands = 1 : i64, tpu.core_type = #tpu.core_type<tc>, window_params = [{transform_indices = @transform_0, window_bounds = array<i64: 16, 32>}, {transform_indices = @transform_1, window_bounds = array<i64: 32, 192>}, {transform_indices = @transform_2, window_bounds = array<i64: 16, 192>}]} {
    %c0_i32 = arith.constant 0 : i32
    %0 = arith.cmpi eq, %arg2, %c0_i32 : i32
    %1 = arith.extui %0 : i1 to i32
    %c0_i32_0 = arith.constant 0 : i32
    %2 = arith.cmpi ne, %1, %c0_i32_0 : i32
    scf.if %2 {
      %cst_10 = arith.constant 0.000000e+00 : f32
      %12 = vector.broadcast %cst_10 : f32 to vector<16x192xf32>
      %c0_11 = arith.constant 0 : index
      %c0_12 = arith.constant 0 : index
      %13 = vector.load %arg6[%c0_11, %c0_12] : memref<16x192xf32, #tpu.memory_space<vmem>>, vector<16x192xf32>
      tpu.vector_store %arg6[%c0_11, %c0_12], %12 {strides = array<i32>} : memref<16x192xf32, #tpu.memory_space<vmem>>, vector<16x192xf32>,
    } else {
    }
    %c0 = arith.constant 0 : index
    %c0_1 = arith.constant 0 : index
    %3 = vector.load %arg6[%c0, %c0_1] : memref<16x192xf32, #tpu.memory_space<vmem>>, vector<16x192xf32>
    %c0_2 = arith.constant 0 : index
    %c0_3 = arith.constant 0 : index
    %4 = vector.load %arg3[%c0_2, %c0_3] : memref<16x32xf32, #tpu.memory_space<vmem>>, vector<16x32xf32>
    %c0_4 = arith.constant 0 : index
    %c0_5 = arith.constant 0 : index
    %5 = vector.load %arg4[%c0_4, %c0_5] : memref<32x192xf32, #tpu.memory_space<vmem>>, vector<32x192xf32>
    %cst = arith.constant dense<0.000000e+00> : vector<16x192xf32>
    %6 = tpu.matmul %4, %5, %cst {dimension_numbers = #tpu.dot_dimension_numbers<[1], [0], [0], [1], [0, 0, 1, 1], [], []>} : vector<16x32xf32>, vector<32x192xf32>, vector<16x192xf32> -> vector<16x192xf32>
    %7 = arith.addf %3, %6 : vector<16x192xf32>
    %c0_6 = arith.constant 0 : index
    %c0_7 = arith.constant 0 : index
    %8 = vector.load %arg6[%c0_6, %c0_7] : memref<16x192xf32, #tpu.memory_space<vmem>>, vector<16x192xf32>
    tpu.vector_store %arg6[%c0_6, %c0_7], %7 {strides = array<i32>} : memref<16x192xf32, #tpu.memory_space<vmem>>, vector<16x192xf32>,
    %c0_i32_8 = arith.constant 0 : i32
    %9 = arith.cmpi eq, %arg2, %c0_i32_8 : i32
    %10 = arith.extui %9 : i1 to i32
    %c0_i32_9 = arith.constant 0 : i32
    %11 = arith.cmpi ne, %10, %c0_i32_9 : i32
    scf.if %11 {
      %c0_10 = arith.constant 0 : index
      %c0_11 = arith.constant 0 : index
      %12 = vector.load %arg6[%c0_10, %c0_11] : memref<16x192xf32, #tpu.memory_space<vmem>>, vector<16x192xf32>
      %c0_12 = arith.constant 0 : index
      %c0_13 = arith.constant 0 : index
      %13 = vector.load %arg5[%c0_12, %c0_13] : memref<16x192xf32, #tpu.memory_space<vmem>>, vector<16x192xf32>
      tpu.vector_store %arg5[%c0_12, %c0_13], %12 {strides = array<i32>} : memref<16x192xf32, #tpu.memory_space<vmem>>, vector<16x192xf32>,
    } else {
    }
    return
  }
  func.func @transform_0(%arg0: i32, %arg1: i32, %arg2: i32) -> (i32, i32) {
    %c0_i32 = arith.constant 0 : i32
    return %arg0, %arg2 : i32, i32
  }
  func.func @transform_1(%arg0: i32, %arg1: i32, %arg2: i32) -> (i32, i32) {
    %c0_i32 = arith.constant 0 : i32
    return %arg2, %arg1 : i32, i32
  }
  func.func @transform_2(%arg0: i32, %arg1: i32, %arg2: i32) -> (i32, i32) {
    %c0_i32 = arith.constant 0 : i32
    return %arg0, %arg1 : i32, i32
  }
}

</mosaic_0001>

<bundles_post_ra>
// kernel: tpu_custom_call.1
= control target key start
LH: loop header
LB: loop body
LE: loop exit
PB: predicated region body
PF: predicated region fallthrough
CT: control target
= control target key end

     0   :  { %7 = vsyncpa [#allocation4], 0  ;;  %s350_s0 = inlined_call_operand.hbm [shape: f32[16,32], index: 0, kind: input, shape index: {}]   ;;  %s351_s1 = inlined_call_operand.hbm [shape: f32[32,192], index: 1, kind: input, shape index: {}]   ;;  %s352_s2 = inlined_call_operand.hbm [shape: f32[16,192], index: 2, kind: output, shape index: {}]  }
   0x1   :  { %8 = vsyncpa [#allocation7], 0 }
   0x2   :  { %9 = vsyncpa [#allocation5], 0  ;;  %s279_s9 = smov [#allocation3]   ;;  %s207_s13 = scalar_lea.hbm %s350_s0, 256 }
   0x3   :  { %s15_s10 = sshll.u32 %s279_s9, 4  ;;  %p208_p0 = scmp.ne.s32.totalorder %s350_s0, %s207_s13  ;;  %s16_s10 = int_to_ptr.vmem [resolvable:$true] %s15_s10 }
   0x4   :  { %p211_p1 = scmp.lt.u32.totalorder %s207_s13, %s350_s0 }
   0x6   :  { %p213_p2 = pnand %p211_p1, %p208_p0 }
   0x8   :  { %216 = shalt.err (!%p213_p2)
}
   0x9   :  { %s217_s18 = scalar_lea.vmem %s16_s10, 256  ;;  %p222_p4 = scmp.lt.s32.totalorder %s16_s10, %s16_s10 }
   0xa   :  { %p218_p3 = scmp.ne.s32.totalorder %s16_s10, %s217_s18  ;;  %p223_p5 = scmp.lt.s32.totalorder %s217_s18, %s217_s18 }
   0xc   :  { %p224_p6 = por %p223_p5, %p222_p4 }
   0xe   :  { %p225_p7 = pnand %p224_p6, %p218_p3 }
  0x10   :  { %228 = shalt.err (!%p225_p7)
}
  0x11   :  { %s280_s19 = smov 128   ;;  %s281_s20 = smov 8  }
  0x12   :  { %21 = dma.hbm_to_vmem [thread:$0]  %s350_s0, 256, %s16_s10, [#allocation4], %s280_s19, %s280_s19, %s281_s20  }
  0x13   :  { %s282_s23 = smov [#allocation6]   ;;  %s229_s27 = scalar_lea.hbm %s351_s1, 1024 }
  0x14   :  { %s27_s24 = sshll.u32 %s282_s23, 4  ;;  %p230_p8 = scmp.ne.s32.totalorder %s351_s1, %s229_s27  ;;  %s28_s24 = int_to_ptr.vmem [resolvable:$true] %s27_s24 }
  0x15   :  { %p233_p9 = scmp.lt.u32.totalorder %s229_s27, %s351_s1 }
  0x17   :  { %p235_p10 = pnand %p233_p9, %p230_p8 }
  0x19   :  { %238 = shalt.err (!%p235_p10)
}
  0x1a   :  { %s239_s4 = scalar_lea.vmem %s28_s24, 1024  ;;  %p244_p12 = scmp.lt.s32.totalorder %s28_s24, %s28_s24 }
  0x1b   :  { %p240_p11 = scmp.ne.s32.totalorder %s28_s24, %s239_s4  ;;  %p245_p13 = scmp.lt.s32.totalorder %s239_s4, %s239_s4 }
  0x1d   :  { %p246_p0 = por %p245_p13, %p244_p12 }
  0x1f   :  { %p247_p1 = pnand %p246_p0, %p240_p11 }
  0x21   :  { %250 = shalt.err (!%p247_p1)
}
  0x22   :  { %s283_s0 = smov 256   ;;  %s284_s5 = smov 16  }
  0x23   :  { %33 = dma.hbm_to_vmem [thread:$0]  %s351_s1, 1024, %s28_s24, [#allocation7], %s283_s0, %s283_s0, %s284_s5  }
  0x24   :  { %273 = dma.done.wait [#allocation4], 256  }
  0x25   :  { %274 = vsyncadd [#allocation4], 4294967040 }
  0x26   :  { %275 = dma.done.wait [#allocation7], 1024  }
  0x27   :  { %276 = vsyncadd [#allocation7], 4294966272  ;;  %v285_v0 = vmov 0.0   ;;  %v56_v1 = vld [vmem:[#allocation6 + $0x8] sm:$0xff]  ;;  %v58_v2 = vld [vmem:[#allocation6 + $0x18] sm:$0xff]  ;;  %vm63_vm0 = vcmask 261120  }
  0x28   :  { %134 = vmatprep.mubr.f32.mxu0 %v285_v0  ;;  %140 = vmatprep.mubr.f32.mxu1 %v285_v0  ;;  %v55_v3 = vld [vmem:[#allocation6] sm:$0xff]  ;;  %v187_v4 = vpack.c.bf16 %v58_v2, %v56_v1  ;;  %v57_v5 = vld [vmem:[#allocation6 + $0x10] sm:$0xff]  ;;  %v60_v6 = vld [vmem:[#allocation6 + $0x28] sm:$0xff]  ;;  %vm45_vm1 = vcmask 523264   ;;  %s286_s1 = smov [#allocation8]  }
  0x29   :  { %v62_v7 = vld [vmem:[#allocation6 + $0x38] sm:$0xff]  ;;  %v189_v8 = vpack.c.bf16 %v57_v5, %v55_v3  ;;  %v59_v10 = vld [vmem:[#allocation6 + $0x20] sm:$0xff]  ;;  %v61_v11 = vld [vmem:[#allocation6 + $0x30] sm:$0xff]  ;;  %46 = vst.msk [vmem:[#allocation2 + $0x8] sm:$0xff] %vm45_vm1, %v285_v0  ;;  %s172_s8 = sshll.u32 %s286_s1, 4  ;;  %s173_s8 = int_to_ptr.vmem [resolvable:$true] %s172_s8 }
  0x2a   :  { %v191_v9 = vpack.c.bf16 %v62_v7, %v60_v6  ;;  %188 = vmatprep.subr.bf16.mxu0 %v187_v4  ;;  %195 = vmatprep.subr.bf16.mxu1 %v187_v4  ;;  %v193_v12 = vpack.c.bf16 %v61_v11, %v59_v10  ;;  %v53_v13 = vld [vmem:[#allocation3] sm:$0xff]  ;;  %v54_v14 = vld [vmem:[#allocation3 + $0x8] sm:$0xff]  ;;  %48 = vst.msk [vmem:[#allocation2 + $0x18] sm:$0xff] %vm45_vm1, %v285_v0  ;;  %s251_s9 = scalar_lea.vmem %s173_s8, 512  ;;  %p256_p3 = scmp.lt.s32.totalorder %s173_s8, %s173_s8 }
  0x2b   :  { %190 = vmatpush1.bf16.msra.mxu0 %v189_v8  ;;  %197 = vmatpush1.bf16.msra.mxu1 %v189_v8  ;;  %p252_p2 = scmp.ne.s32.totalorder %s173_s8, %s251_s9  ;;  %p257_p4 = scmp.lt.s32.totalorder %s251_s9, %s251_s9 }
  0x2c   :  { %192 = vmatprep.subr.bf16.mxu0 %v191_v9  ;;  %196 = vmatprep.subr.bf16.mxu1 %v191_v9 }
  0x2d   :  { %p258_p5 = por %p257_p4, %p256_p3 }
  0x2f   :  { %194 = vmatpush1.bf16.msra.mxu0 %v193_v12  ;;  %198 = vmatpush1.bf16.msra.mxu1 %v193_v12  ;;  %p259_p6 = pnand %p258_p5, %p252_p2 }
  0x30   :  { %v50_v15 = vld [vmem:[#allocation2 + $0x8] sm:$0xff] }
  0x31   :  { %v52_v16 = vld [vmem:[#allocation2 + $0x18] sm:$0xff] }
  0x32   :  { %185 = vmatmul.mubr.msk.f32.vlgmr.msra.gmra.mrb[0].mxu0 %vm63_vm0, %v53_v13  ;;  %186 = vmatmul.mubr.msk.f32.vlgmr.msra.gmra.mrb[0].mxu1 %vm63_vm0, %v54_v14 }
 0x105   :  { %v136_v17 = vpop.f32.mrb[0].mxu0  ;;  %v142_v18 = vpop.f32.mrb[0].mxu1 }
 0x106   :  { %v138_v19 = vpop.f32.mrb[1].mxu0  ;;  %v144_v20 = vpop.f32.mrb[1].mxu1  ;;  %163 = vst [vmem:[#allocation8] sm:$0xff] %v136_v17  ;;  %165 = vst [vmem:[#allocation8 + $0x10] sm:$0xff] %v142_v18 }
 0x107   :  { %v148_v21 = vadd.f32 %v138_v19, %v50_v15  ;;  %v150_v22 = vadd.f32 %v144_v20, %v52_v16 }
 0x109   :  { %153 = vst.msk [vmem:[#allocation2 + $0x8] sm:$0xff] %vm45_vm1, %v148_v21  ;;  %155 = vst.msk [vmem:[#allocation2 + $0x18] sm:$0xff] %vm45_vm1, %v150_v22 }
 0x110   :  { %v160_v23 = vld [vmem:[#allocation2 + $0x8] sm:$0xff]  ;;  %v162_v24 = vld [vmem:[#allocation2 + $0x18] sm:$0xff] }
 0x111   :  { %164 = vst.msk [vmem:[#allocation8 + $0x8] sm:$0xff] %vm45_vm1, %v160_v23  ;;  %166 = vst.msk [vmem:[#allocation8 + $0x18] sm:$0xff] %vm45_vm1, %v162_v24 }
 0x112   :  { %262 = shalt.err (!%p259_p6)
}
 0x113   :  { %s263_s12 = scalar_lea.hbm %s352_s2, 512 }
 0x114   :  { %p264_p7 = scmp.ne.s32.totalorder %s352_s2, %s263_s12  ;;  %p267_p8 = scmp.lt.u32.totalorder %s263_s12, %s352_s2 }
 0x116   :  { %p269_p9 = pnand %p267_p8, %p264_p7 }
 0x118   :  { %272 = shalt.err (!%p269_p9)
}
 0x119   :  { %178 = dma.vmem_to_hbm [thread:$0]  %s173_s8, 512, %s352_s2, [#allocation5], %s283_s0, %s283_s0, %s284_s5  }
 0x11a   :  { %277 = dma.done.wait [#allocation5], 512  }
 0x11b   :  { %278 = vsyncadd [#allocation5], 4294966784 }
 0x11c   :  { %182 = vsyncpa [#allocation4], 1 }
 0x11d   :  { %183 = vsyncpa [#allocation7], 1 }
 0x11e   :  { %184 = vsyncpa [#allocation5], 1 }

</bundles_post_ra>
